<compile_context>
chip_gen: v6e
topology: v6e:2x2x1
jax: 0.10.0
libtpu: 0.0.40
codegen_flags: <defaults>
</compile_context>

<pallas_src>
import functools
import math

import jax
import jax.numpy as jnp
from jax.experimental import pallas as pl
from jax.experimental.pallas import tpu as pltpu


# --------------------------------------------------------------------------- #
# Kernel bodies
# --------------------------------------------------------------------------- #
def _make_kernel(flatten_rows: bool, fuse_taps: bool):
    """Build the kernel body for one (tb, L, C) -> (tb, L, D) block.

    flatten_rows: collapse (tb, L, ·) to (tb*L, ·) and issue one big matmul
        (requires L sublane-aligned so the relayout is free); otherwise loop
        over the tb batch rows with plain 2-D matmuls.
    fuse_taps: concatenate the 3 circular taps along lanes and contract with a
        single (3C, D) weight (only when 3C <= 128 so the concat stays inside
        one 128-lane tile); otherwise three accumulated matmuls vs (3, C, D).
    """

    def matmul_rows(w_ref, rows_prev, rows_cur, rows_next):
        # rows_*: (M, C) 2-D slabs; returns (M, D) f32.
        if fuse_taps:
            cat = jnp.concatenate([rows_prev, rows_cur, rows_next], axis=-1)
            return jnp.dot(cat, w_ref[...], preferred_element_type=jnp.float32)
        acc = jnp.dot(rows_cur, w_ref[1], preferred_element_type=jnp.float32)
        acc += jnp.dot(rows_prev, w_ref[0], preferred_element_type=jnp.float32)
        acc += jnp.dot(rows_next, w_ref[2], preferred_element_type=jnp.float32)
        return acc

    if flatten_rows:

        def kernel(x_ref, w_ref, o_ref):
            x = x_ref[...]                                   # (tb, L, C)
            tb, L, C = x.shape
            # Circular neighbours along each row's own full-L sequence axis,
            # so the wrap-around is exact without a halo (XLU roll, cheap).
            xp = jnp.roll(x, 1, axis=1).reshape(tb * L, C)    # x[:, (t-1)%L, :]
            xn = jnp.roll(x, -1, axis=1).reshape(tb * L, C)   # x[:, (t+1)%L, :]
            xc = x.reshape(tb * L, C)
            acc = matmul_rows(w_ref, xp, xc, xn)              # (tb*L, D) f32
            o_ref[...] = acc.reshape(tb, L, -1).astype(o_ref.dtype)

    else:

        def kernel(x_ref, w_ref, o_ref):
            # Per-row 2-D path: keeps the big batch-fused DMA block even when
            # L is not sublane-aligned (compute is hidden under the DMA
            # pipeline in this HBM-bound kernel).
            def body(i, carry):
                xi = x_ref[i]                                 # (L, C)
                acc = matmul_rows(
                    w_ref, jnp.roll(xi, 1, axis=0), xi, jnp.roll(xi, -1, axis=0))
                o_ref[i] = acc.astype(o_ref.dtype)
                return carry

            jax.lax.fori_loop(0, x_ref.shape[0], body, 0)

    return kernel


# --------------------------------------------------------------------------- #
# Hardware queries & tile sizing
# --------------------------------------------------------------------------- #
def _vmem_capacity_bytes() -> int:
    try:
        return int(pltpu.get_tpu_info().vmem_capacity_bytes)
    except Exception:
        return 64 * 1024 * 1024          # v7x-sized conservative fallback


def _num_tensorcores_per_chip() -> int:
    # v4 / v5p (megacore) and v7x have 2 TensorCores per chip; v5e / v6e have 1.
    try:
        kind = jax.devices()[0].device_kind.lower()
    except Exception:
        return 1
    return 2 if any(t in kind for t in ("v4", "v5p", "v7", "tpu7")) else 1


def _round_up(x, m):
    return (x + m - 1) // m * m


def _sublane(itemsize):
    return {4: 8, 2: 16, 1: 32}.get(itemsize, 8)


def _per_step_vmem_bytes(tb, *, L, C, D, in_itemsize, out_itemsize, fuse_taps):
    """Conservative per-grid-step VMEM footprint: double-buffered pipeline
    tiles (with 128-lane / sublane padding) plus in-kernel temporaries
    (x_prev/x_next, the concatenated taps, and the f32 accumulator)."""
    sub_in = _sublane(in_itemsize)
    sub_out = _sublane(out_itemsize)
    Cp, Dp = _round_up(C, 128), _round_up(D, 128)
    Lp_in, Lp_out, Lp_f32 = (_round_up(L, sub_in), _round_up(L, sub_out),
                             _round_up(L, 8))

    x_tile = tb * Lp_in * Cp * in_itemsize                # (tb, L, C) block
    o_tile = tb * Lp_out * Dp * out_itemsize              # (tb, L, D) block
    if fuse_taps:
        w_tile = _round_up(3 * C, sub_in) * Dp * in_itemsize
        cat_tmp = tb * Lp_in * _round_up(3 * C, 128) * in_itemsize
    else:
        w_tile = 3 * _round_up(C, sub_in) * Dp * in_itemsize
        cat_tmp = 0
    acc_tmp = tb * Lp_f32 * Dp * 4                        # f32 accumulator
    roll_tmp = 2 * x_tile                                 # x_prev / x_next
    return 2 * (x_tile + o_tile + w_tile) + roll_tmp + cat_tmp + acc_tmp


def _choose_block_batch(B, L, fits, target_rows, num_tc):
    """How many batch rows to fuse per grid step.

    Priorities: stay inside the VMEM budget; reach >= target_rows output
    sublanes per step (amortize ~0.35us/step overhead); prefer exact divisors
    of B (no wasted tail block); on 2-TensorCore chips prefer a grid extent
    divisible by the core count so both cores get work."""
    cands = [tb for tb in range(1, B + 1) if fits(tb)]
    if not cands:
        return 1
    grid = lambda tb: -(-B // tb)
    divs = [tb for tb in cands if B % tb == 0]
    pools = []
    if num_tc > 1:
        pools.append([tb for tb in divs if grid(tb) % num_tc == 0])
        pools.append([tb for tb in cands if grid(tb) % num_tc == 0])
    pools += [divs, cands]
    for pool in pools:                       # smallest tile hitting row target
        hit = [tb for tb in pool if tb * L >= target_rows]
        if hit:
            return min(hit)
    for pool in pools:                       # otherwise fewest grid steps
        if pool:
            return max(pool)
    return 1


# --------------------------------------------------------------------------- #
# Public wrapper
# --------------------------------------------------------------------------- #
@functools.partial(jax.jit, static_argnames=("compute_dtype", "out_dtype"))
def token_embedding(x, weight, compute_dtype=None, out_dtype=None):
    """TokenEmbedding forward (circular Conv1d, k=3, no bias).

    x: [B, L, c_in]; weight: [d_model, c_in, 3] (PyTorch Conv1d layout).
    Returns [B, L, d_model] in `out_dtype` (default: x.dtype).

    The kernel is HBM-bandwidth bound on v5e/v6e/v7x, so the levers are bytes:
    pass compute_dtype=jnp.bfloat16 to halve streamed input/weight bytes and
    out_dtype=jnp.bfloat16 when downstream accepts it (output bytes dominate
    when d_model >> c_in).  Accumulation always stays f32 on the MXU.
    """
    B, L, C = x.shape
    D = weight.shape[0]
    out_dtype = jnp.dtype(out_dtype) if out_dtype is not None else x.dtype
    if compute_dtype is not None:
        x = x.astype(compute_dtype)
    cdtype = x.dtype
    in_itemsize = jnp.dtype(cdtype).itemsize
    out_itemsize = jnp.dtype(out_dtype).itemsize

    # Taps-major weight (3, C, D); fused into a single (3C, D) right-multiply
    # when the in-kernel lane concat stays inside one 128-lane tile.
    w = jnp.transpose(weight, (2, 1, 0)).astype(cdtype)        # (3, C, D)
    fuse_taps = 3 * C <= 128
    if fuse_taps:
        w = w.reshape(3 * C, D)
        w_spec = pl.BlockSpec((3 * C, D), lambda b: (0, 0))
    else:
        w_spec = pl.BlockSpec((3, C, D), lambda b: (0, 0, 0))

    # Collapse (tb, L) -> tb*L only when the relayout is free for the compute
    # dtype; otherwise use the per-row loop (no more tb=1 fallback).
    flatten_rows = (L % _sublane(in_itemsize)) == 0

    # VMEM budget from the actual chip (v5e/v6e: 128 MiB, v7x: 64 MiB).
    vmem_cap = _vmem_capacity_bytes()
    vmem_limit = min(vmem_cap * 3 // 4, 112 * 1024 * 1024)
    budget = vmem_limit * 4 // 5            # headroom for compiler scratch

    fits = lambda tb: _per_step_vmem_bytes(
        tb, L=L, C=C, D=D, in_itemsize=in_itemsize,
        out_itemsize=out_itemsize, fuse_taps=fuse_taps) <= budget
    tb = _choose_block_batch(B, L, fits, target_rows=512,
                             num_tc=_num_tensorcores_per_chip())
    grid = pl.cdiv(B, tb)                   # tail block handled by Pallas

    cost = pl.CostEstimate(
        flops=2 * B * L * (3 * C) * D,
        transcendentals=0,
        bytes_accessed=(B * L * C + 3 * C * D) * in_itemsize
        + B * L * D * out_itemsize,
    )

    kernel = _make_kernel(flatten_rows, fuse_taps)

    return pl.pallas_call(
        kernel,
        out_shape=jax.ShapeDtypeStruct((B, L, D), out_dtype),
        grid_spec=pltpu.PrefetchScalarGridSpec(
            num_scalar_prefetch=0,
            grid=(grid,),
            in_specs=[
                pl.BlockSpec((tb, L, C), lambda b: (b, 0, 0)),  # tb batch rows
                w_spec,                                          # whole weight
            ],
            out_specs=pl.BlockSpec((tb, L, D), lambda b: (b, 0, 0)),
        ),
        compiler_params=pltpu.CompilerParams(
            dimension_semantics=("parallel",),
            vmem_limit_bytes=int(vmem_limit),
        ),
        cost_estimate=cost,
    )(x, w)


def token_embedding_ref(x, weight):
    """Plain-JAX reference of the circular conv1d (for verification)."""
    w = jnp.transpose(weight, (2, 1, 0)).astype(x.dtype)   # (3, C, D)
    x_prev = jnp.roll(x, 1, axis=1)
    x_next = jnp.roll(x, -1, axis=1)
    return (jnp.einsum("blc,cd->bld", x_prev, w[0])
            + jnp.einsum("blc,cd->bld", x, w[1])
            + jnp.einsum("blc,cd->bld", x_next, w[2]))


if __name__ == "__main__":
    B, L, c_in, d_model = 2, 8, 4, 32

    key = jax.random.PRNGKey(0)
    kx, kw = jax.random.split(key)

    # Deterministic Kaiming-normal init (fan_in mode, leaky_relu nonlinearity),
    # matching nn.init.kaiming_normal_ on a Conv1d weight [d_model, c_in, 3].
    fan_in = c_in * 3
    gain = math.sqrt(2.0 / (1.0 + 0.01 ** 2))
    std = gain / math.sqrt(fan_in)
    weight = std * jax.random.normal(kw, (d_model, c_in, 3), dtype=jnp.float32)

    x = jax.random.normal(kx, (B, L, c_in), dtype=jnp.float32)

    out = token_embedding(x, weight)
    out = jax.block_until_ready(out)

    ref = token_embedding_ref(x, weight)
    assert out.shape == (B, L, d_model), out.shape
    assert jnp.allclose(out, ref, atol=1e-5, rtol=1e-5), "mismatch vs reference"

    print("KERNEL_OK")
</pallas_src>

<mosaic_0001>
module attributes {stable_mosaic.version = 11 : i64} {
  func.func @kernel(%arg0: i32, %arg1: memref<2x8x4xf32, #tpu.memory_space<vmem>>, %arg2: memref<12x32xf32, #tpu.memory_space<vmem>>, %arg3: memref<2x8x32xf32, #tpu.memory_space<vmem>>) attributes {dimension_semantics = [#tpu.dimension_semantics<parallel>], iteration_bounds = array<i64: 1>, scalar_prefetch = 0 : i64, scratch_operands = 0 : i64, tpu.core_type = #tpu.core_type<tc>, window_params = [{transform_indices = @transform_0, window_bounds = array<i64: 2, 8, 4>}, {pipeline_mode = #tpu.pipeline_mode<synchronous>, transform_indices = @transform_1, window_bounds = array<i64: 12, 32>}, {transform_indices = @transform_2, window_bounds = array<i64: 2, 8, 32>}]} {
    %c0 = arith.constant 0 : index
    %c0_0 = arith.constant 0 : index
    %c0_1 = arith.constant 0 : index
    %0 = vector.load %arg1[%c0, %c0_0, %c0_1] : memref<2x8x4xf32, #tpu.memory_space<vmem>>, vector<2x8x4xf32>
    %1 = vector.extract_strided_slice %0 {offsets = [0, 7, 0], sizes = [2, 1, 4], strides = [1, 1, 1]} : vector<2x8x4xf32> to vector<2x1x4xf32>
    %2 = vector.extract_strided_slice %0 {offsets = [0, 0, 0], sizes = [2, 7, 4], strides = [1, 1, 1]} : vector<2x8x4xf32> to vector<2x7x4xf32>
    %3 = tpu.concatenate %1, %2 in 1 : vector<2x1x4xf32>, vector<2x7x4xf32> -> vector<2x8x4xf32>
    %4 = vector.shape_cast %3 : vector<2x8x4xf32> to vector<16x4xf32>
    %5 = vector.extract_strided_slice %0 {offsets = [0, 1, 0], sizes = [2, 7, 4], strides = [1, 1, 1]} : vector<2x8x4xf32> to vector<2x7x4xf32>
    %6 = vector.extract_strided_slice %0 {offsets = [0, 0, 0], sizes = [2, 1, 4], strides = [1, 1, 1]} : vector<2x8x4xf32> to vector<2x1x4xf32>
    %7 = tpu.concatenate %5, %6 in 1 : vector<2x7x4xf32>, vector<2x1x4xf32> -> vector<2x8x4xf32>
    %8 = vector.shape_cast %7 : vector<2x8x4xf32> to vector<16x4xf32>
    %9 = vector.shape_cast %0 : vector<2x8x4xf32> to vector<16x4xf32>
    %10 = tpu.concatenate %4, %9, %8 in 1 : vector<16x4xf32>, vector<16x4xf32>, vector<16x4xf32> -> vector<16x12xf32>
    %c0_2 = arith.constant 0 : index
    %c0_3 = arith.constant 0 : index
    %11 = vector.load %arg2[%c0_2, %c0_3] : memref<12x32xf32, #tpu.memory_space<vmem>>, vector<12x32xf32>
    %cst = arith.constant dense<0.000000e+00> : vector<16x32xf32>
    %12 = tpu.matmul %10, %11, %cst {dimension_numbers = #tpu.dot_dimension_numbers<[1], [0], [0], [1], [0, 0, 1, 1], [], []>} : vector<16x12xf32>, vector<12x32xf32>, vector<16x32xf32> -> vector<16x32xf32>
    %13 = vector.shape_cast %12 : vector<16x32xf32> to vector<2x8x32xf32>
    %c0_4 = arith.constant 0 : index
    %c0_5 = arith.constant 0 : index
    %c0_6 = arith.constant 0 : index
    %14 = vector.load %arg3[%c0_4, %c0_5, %c0_6] : memref<2x8x32xf32, #tpu.memory_space<vmem>>, vector<2x8x32xf32>
    tpu.vector_store %arg3[%c0_4, %c0_5, %c0_6], %13 {strides = array<i32>} : memref<2x8x32xf32, #tpu.memory_space<vmem>>, vector<2x8x32xf32>,
    return
  }
  func.func @transform_0(%arg0: i32) -> (i32, i32, i32) {
    %c0_i32 = arith.constant 0 : i32
    %c0_i32_0 = arith.constant 0 : i32
    %c0_i32_1 = arith.constant 0 : i32
    return %arg0, %c0_i32, %c0_i32_0 : i32, i32, i32
  }
  func.func @transform_1(%arg0: i32) -> (i32, i32) {
    %c0_i32 = arith.constant 0 : i32
    %c0_i32_0 = arith.constant 0 : i32
    %c0_i32_1 = arith.constant 0 : i32
    return %c0_i32, %c0_i32_0 : i32, i32
  }
  func.func @transform_2(%arg0: i32) -> (i32, i32, i32) {
    %c0_i32 = arith.constant 0 : i32
    %c0_i32_0 = arith.constant 0 : i32
    %c0_i32_1 = arith.constant 0 : i32
    return %arg0, %c0_i32, %c0_i32_0 : i32, i32, i32
  }
}

</mosaic_0001>

<bundles_post_ra>
// kernel: token_embedding.1
= control target key start
LH: loop header
LB: loop body
LE: loop exit
PB: predicated region body
PF: predicated region fallthrough
CT: control target
= control target key end

     0   :  { %vm59_vm0 = vcmask 1043456   ;;  %s197_s13 = smov 4   ;;  %s234_s0 = inlined_call_operand.vmem [shape: f32[2,8,4], index: 0, kind: input, shape index: {}]   ;;  %s235_s1 = inlined_call_operand.vmem [shape: f32[12,32], index: 1, kind: input, shape index: {}]   ;;  %s236_s2 = inlined_call_operand.hbm [shape: f32[2,8,32], index: 2, kind: output, shape index: {}]  }
   0x1   :  { %v12_v0 = vld [vmem:[%s234_s0] sm:$0xff]  ;;  %v13_v1 = vld [vmem:[%s234_s0 + $0x8] sm:$0xff] }
   0x2   :  { %30 = vrot.lane.b32.xlu0 %v12_v0, %s197_s13  ;;  %v23_v2 = vrot.slane %v12_v0, 1  ;;  %v51_v3 = vld [vmem:[%s235_s1 + $0x8] sm:$0xf]  ;;  %v50_v4 = vld [vmem:[%s235_s1] sm:$0xff] }
   0x3   :  { %164 = vmatprep.subr.msk.mxu0 %vm59_vm0, %v51_v3 }
   0x4   :  { %7 = vsyncpa [#allocation3], 0  ;;  %s198_s18 = smov 8   ;;  %v24_v5 = vrot.slane %v13_v1, 1  ;;  %165 = vmatpush3.msk.msra.mxu0 %vm59_vm0, %v51_v3  ;;  %v16_v6 = vrot.slane %v12_v0, 7  ;;  %vm44_vm1 = vcmask 31744  }
   0x5   :  { %38 = vrot.lane.b32.xlu1 %v23_v2, %s198_s18  ;;  %166 = vmatprep.subr.mxu0 %v50_v4  ;;  %vm47_vm2 = vcmask 64512   ;;  %v17_v8 = vrot.slane %v13_v1, 7  ;;  %vm52_vm3 = vcmask 97280   ;;  %vm138_vm4 = vcmask 261120   ;;  %s199_s0 = smov [#allocation2]  }
   0x6   :  { %32 = vrot.lane.b32.xlu0 %v13_v1, %s197_s13  ;;  %167 = vmatpush3.msra.mxu0 %v50_v4  ;;  %s146_s1 = sshll.u32 %s199_s0, 4  ;;  %s147_s1 = int_to_ptr.vmem [resolvable:$true] %s146_s1 }
   0x7   :  { %s175_s19 = scalar_lea.vmem %s147_s1, 256  ;;  %p180_p1 = scmp.lt.s32.totalorder %s147_s1, %s147_s1 }
   0x8   :  { %p176_p0 = scmp.ne.s32.totalorder %s147_s1, %s175_s19  ;;  %p181_p2 = scmp.lt.s32.totalorder %s175_s19, %s175_s19 }
   0x9   :  { %40 = vrot.lane.b32.xlu1 %v24_v5, %s198_s18 }
   0xa   :  { %p182_p3 = por %p181_p2, %p180_p1 }
   0xc   :  { %p183_p4 = pnand %p182_p3, %p176_p0 }
  0x74   :  { %v31_v7 = vpop.permute.xlu0 %30 }
  0x75   :  { %v45_v9 = vsel %vm44_vm1, %v16_v6, %v31_v7 }
  0x77   :  { %v39_v10 = vpop.permute.xlu1 %38 }
  0x78   :  { %v48_v11 = vsel %vm47_vm2, %v45_v9, %v39_v10  ;;  %v33_v12 = vpop.permute.xlu0 %32 }
  0x79   :  { %168 = vmatprep.mubr.msk.f32.mxu0 %vm52_vm3, %v48_v11  ;;  %v46_v13 = vsel %vm44_vm1, %v17_v8, %v33_v12 }
  0x7b   :  { %v41_v14 = vpop.permute.xlu1 %40 }
  0x7c   :  { %v49_v15 = vsel %vm47_vm2, %v46_v13, %v41_v14 }
  0x7d   :  { %169 = vmatmul.mubr.msk.f32.vlgmr.msra.gmra.mxu0 %vm52_vm3, %v49_v15 }
 0x13d   :  { %v170_v16 = vpop.f32.mrf.mxu0 }
 0x13e   :  { %140 = vst.msk [vmem:[#allocation2 + $0x8] sm:$0xff] %vm138_vm4, %v170_v16 }
 0x13f   :  { %v129_v17 = vpop.f32.mrf.mxu0 }
 0x140   :  { %139 = vst.msk [vmem:[#allocation2] sm:$0xff] %vm138_vm4, %v129_v17 }
 0x141   :  { %186 = shalt.err (!%p183_p4)
}
 0x142   :  { %s200_s20 = smov 128  }
 0x143   :  { %152 = dma.vmem_to_hbm [thread:$0]  %s147_s1, 256, %s236_s2, [#allocation3], %s200_s20, %s200_s20, %s198_s18  }
 0x144   :  { %195 = dma.done.wait [#allocation3], 256  }
 0x145   :  { %196 = vsyncadd [#allocation3], 4294967040 }
 0x146   :  { %156 = vsyncpa [#allocation3], 1 }

</bundles_post_ra>
